<compile_context>
chip_gen: v5e
topology: v5e:2x2
jax: 0.10.0
libtpu: 0.0.40
codegen_flags: <defaults>
</compile_context>

<pallas_src>
import jax
import jax.numpy as jnp
from jax.experimental import pallas as pl
from jax.experimental.pallas import tpu as pltpu


def _round_up(x, m):
    return ((x + m - 1) // m) * m


def _gap_conv1x1_kernel(x_ref, w_ref, b_ref, o_ref, acc_ref):
    # x_ref:   (1, THW, C_in)      f32   -- one batch element, one spatial chunk
    # w_ref:   (C_in, C_out_pad)   f32   -- weights pre-scaled by 1/(H*W)
    # b_ref:   (1, C_out_pad)      f32
    # o_ref:   (1, 1, C_out_pad)   f32
    # acc_ref: (1, C_out_pad)      f32   -- VMEM scratch accumulator
    s = pl.program_id(1)

    @pl.when(s == 0)
    def _init():
        acc_ref[...] = jnp.zeros_like(acc_ref)

    xb = x_ref[0]  # (THW, C_in), C_in lane-dense
    # MXU: (THW, C_in) @ (C_in, C_out_pad) -> (THW, C_out_pad)
    part = jnp.dot(xb, w_ref[...], preferred_element_type=jnp.float32)
    # tiny sublane reduction over the spatial rows of this chunk
    acc_ref[...] += jnp.sum(part, axis=0, keepdims=True)

    @pl.when(s == pl.num_programs(1) - 1)
    def _finalize():
        o_ref[...] = (acc_ref[...] + b_ref[...]).reshape(o_ref.shape)


def gap_conv1x1(x_nchw, weight, bias, *, max_rows_per_block=512):
    """x_nchw: (N, C_in, H, W); weight: (C_out, C_in, 1, 1); bias: (C_out,).

    Returns (N, C_out, 1, 1), matching PyTorch
    `conv2d(x.mean((2, 3), keepdim=True))`.
    """
    n, c_in, h, w = x_nchw.shape
    c_out = weight.shape[0]
    hw = h * w

    # NCHW -> (N, HW, C_in): channels on lanes, spatial on sublanes.
    x_nhwc = jnp.transpose(x_nchw, (0, 2, 3, 1)).reshape(n, hw, c_in)
    x_nhwc = x_nhwc.astype(jnp.float32)

    # Choose spatial chunk size (multiple of 8) and pad HW with zeros so the
    # grid tiles exactly. Zero rows contribute nothing to the (weight-scaled)
    # sum, and we divide by the *true* HW via the folded scale, so padding is
    # exact.
    hw8 = _round_up(hw, 8)
    thw = hw8 if hw8 <= max_rows_per_block else max_rows_per_block
    hw_pad = _round_up(hw, thw)
    if hw_pad != hw:
        x_nhwc = jnp.pad(x_nhwc, ((0, 0), (0, hw_pad - hw), (0, 0)))

    # Fold mean scale into weights; pad C_out to a full lane width (128).
    c_out_pad = _round_up(c_out, 128)
    w_mat = weight.reshape(c_out, c_in).T.astype(jnp.float32) * (1.0 / hw)
    w_mat = jnp.pad(w_mat, ((0, 0), (0, c_out_pad - c_out)))          # (C_in, C_out_pad)
    b_mat = jnp.pad(bias.astype(jnp.float32).reshape(1, c_out),
                    ((0, 0), (0, c_out_pad - c_out)))                 # (1, C_out_pad)

    num_s = hw_pad // thw
    grid = (n, num_s)

    out = pl.pallas_call(
        _gap_conv1x1_kernel,
        out_shape=jax.ShapeDtypeStruct((n, 1, c_out_pad), jnp.float32),
        grid_spec=pltpu.PrefetchScalarGridSpec(
            num_scalar_prefetch=0,
            grid=grid,
            in_specs=[
                pl.BlockSpec((1, thw, c_in), lambda i, s: (i, s, 0)),
                pl.BlockSpec((c_in, c_out_pad), lambda i, s: (0, 0)),
                pl.BlockSpec((1, c_out_pad), lambda i, s: (0, 0)),
            ],
            out_specs=pl.BlockSpec((1, 1, c_out_pad), lambda i, s: (i, 0, 0)),
            scratch_shapes=[pltpu.VMEM((1, c_out_pad), jnp.float32)],
        ),
        compiler_params=pltpu.CompilerParams(
            dimension_semantics=("parallel", "arbitrary"),
            vmem_limit_bytes=32 << 20,
        ),
        cost_estimate=pl.CostEstimate(
            flops=2 * n * hw_pad * c_in * c_out_pad,
            transcendentals=0,
            bytes_accessed=(n * hw_pad * c_in + c_in * c_out_pad + n * c_out_pad) * 4,
        ),
    )(x_nhwc, w_mat, b_mat)

    return out[:, 0, :c_out].reshape(n, c_out, 1, 1)


if __name__ == "__main__":
    key = jax.random.PRNGKey(0)
    kx, kw, kb = jax.random.split(key, 3)

    # Small shapes consistent with the module (C_in=240, C_out=10 fixed by the Conv2d).
    N, C_IN, H, W = 2, 240, 8, 8
    C_OUT = 10

    x = jax.random.normal(kx, (N, C_IN, H, W), dtype=jnp.float32)
    weight = jax.random.normal(kw, (C_OUT, C_IN, 1, 1), dtype=jnp.float32) * 0.05
    bias = jax.random.normal(kb, (C_OUT,), dtype=jnp.float32) * 0.05

    y = gap_conv1x1(x, weight, bias)
    jax.block_until_ready(y)

    # Reference in plain JAX (same semantics as the PyTorch module).
    ref = jnp.einsum(
        "nc,oc->no", jnp.mean(x, axis=(2, 3)), weight.reshape(C_OUT, C_IN)
    ) + bias
    ref = ref.reshape(N, C_OUT, 1, 1)

    assert y.shape == (N, C_OUT, 1, 1)
    assert jnp.allclose(y, ref, atol=1e-4, rtol=1e-4)
    print("KERNEL_OK")
</pallas_src>

<mosaic_0001>
module attributes {stable_mosaic.version = 11 : i64} {
  func.func @_gap_conv1x1_kernel(%arg0: i32, %arg1: i32, %arg2: memref<1x64x240xf32, #tpu.memory_space<vmem>>, %arg3: memref<240x128xf32, #tpu.memory_space<vmem>>, %arg4: memref<1x128xf32, #tpu.memory_space<vmem>>, %arg5: memref<1x1x128xf32, #tpu.memory_space<vmem>>, %arg6: memref<1x128xf32, #tpu.memory_space<vmem>>) attributes {dimension_semantics = [#tpu.dimension_semantics<parallel>, #tpu.dimension_semantics<arbitrary>], iteration_bounds = array<i64: 2, 1>, scalar_prefetch = 0 : i64, scratch_operands = 1 : i64, tpu.core_type = #tpu.core_type<tc>, window_params = [{transform_indices = @transform_0, window_bounds = array<i64: 1, 64, 240>}, {pipeline_mode = #tpu.pipeline_mode<synchronous>, transform_indices = @transform_1, window_bounds = array<i64: 240, 128>}, {pipeline_mode = #tpu.pipeline_mode<synchronous>, transform_indices = @transform_2, window_bounds = array<i64: 1, 128>}, {transform_indices = @transform_3, window_bounds = array<i64: 1, 1, 128>}]} {
    %c0_i32 = arith.constant 0 : i32
    %0 = arith.cmpi eq, %arg1, %c0_i32 : i32
    %1 = arith.extui %0 : i1 to i32
    %c0_i32_0 = arith.constant 0 : i32
    %2 = arith.cmpi ne, %1, %c0_i32_0 : i32
    scf.if %2 {
      %cst_12 = arith.constant 0.000000e+00 : f32
      %15 = vector.broadcast %cst_12 : f32 to vector<1x128xf32>
      %c0_13 = arith.constant 0 : index
      %c0_14 = arith.constant 0 : index
      %16 = vector.load %arg6[%c0_13, %c0_14] : memref<1x128xf32, #tpu.memory_space<vmem>>, vector<1x128xf32>
      tpu.vector_store %arg6[%c0_13, %c0_14], %15 {strides = array<i32>} : memref<1x128xf32, #tpu.memory_space<vmem>>, vector<1x128xf32>,
    } else {
    }
    %c0 = arith.constant 0 : index
    %c0_1 = arith.constant 0 : index
    %c0_2 = arith.constant 0 : index
    %3 = vector.load %arg2[%c0, %c0_1, %c0_2] : memref<1x64x240xf32, #tpu.memory_space<vmem>>, vector<1x64x240xf32>
    %4 = vector.shape_cast %3 : vector<1x64x240xf32> to vector<64x240xf32>
    %c0_3 = arith.constant 0 : index
    %c0_4 = arith.constant 0 : index
    %5 = vector.load %arg3[%c0_3, %c0_4] : memref<240x128xf32, #tpu.memory_space<vmem>>, vector<240x128xf32>
    %cst = arith.constant dense<0.000000e+00> : vector<64x128xf32>
    %6 = tpu.matmul %4, %5, %cst {dimension_numbers = #tpu.dot_dimension_numbers<[1], [0], [0], [1], [0, 0, 1, 1], [], []>} : vector<64x240xf32>, vector<240x128xf32>, vector<64x128xf32> -> vector<64x128xf32>
    %c0_5 = arith.constant 0 : index
    %c0_6 = arith.constant 0 : index
    %7 = vector.load %arg6[%c0_5, %c0_6] : memref<1x128xf32, #tpu.memory_space<vmem>>, vector<1x128xf32>
    %cst_7 = arith.constant dense<0.000000e+00> : vector<128xf32>
    %8 = vector.multi_reduction <add>, %6, %cst_7 [0] : vector<64x128xf32> to vector<128xf32>
    %9 = vector.shape_cast %8 : vector<128xf32> to vector<1x128xf32>
    %10 = arith.addf %7, %9 : vector<1x128xf32>
    %c0_8 = arith.constant 0 : index
    %c0_9 = arith.constant 0 : index
    %11 = vector.load %arg6[%c0_8, %c0_9] : memref<1x128xf32, #tpu.memory_space<vmem>>, vector<1x128xf32>
    tpu.vector_store %arg6[%c0_8, %c0_9], %10 {strides = array<i32>} : memref<1x128xf32, #tpu.memory_space<vmem>>, vector<1x128xf32>,
    %c0_i32_10 = arith.constant 0 : i32
    %12 = arith.cmpi eq, %arg1, %c0_i32_10 : i32
    %13 = arith.extui %12 : i1 to i32
    %c0_i32_11 = arith.constant 0 : i32
    %14 = arith.cmpi ne, %13, %c0_i32_11 : i32
    scf.if %14 {
      %c0_12 = arith.constant 0 : index
      %c0_13 = arith.constant 0 : index
      %15 = vector.load %arg6[%c0_12, %c0_13] : memref<1x128xf32, #tpu.memory_space<vmem>>, vector<1x128xf32>
      %c0_14 = arith.constant 0 : index
      %c0_15 = arith.constant 0 : index
      %16 = vector.load %arg4[%c0_14, %c0_15] : memref<1x128xf32, #tpu.memory_space<vmem>>, vector<1x128xf32>
      %17 = arith.addf %15, %16 : vector<1x128xf32>
      %18 = vector.shape_cast %17 : vector<1x128xf32> to vector<1x1x128xf32>
      %c0_16 = arith.constant 0 : index
      %c0_17 = arith.constant 0 : index
      %c0_18 = arith.constant 0 : index
      %19 = vector.load %arg5[%c0_16, %c0_17, %c0_18] : memref<1x1x128xf32, #tpu.memory_space<vmem>>, vector<1x1x128xf32>
      tpu.vector_store %arg5[%c0_16, %c0_17, %c0_18], %18 {strides = array<i32>} : memref<1x1x128xf32, #tpu.memory_space<vmem>>, vector<1x1x128xf32>,
    } else {
    }
    return
  }
  func.func @transform_0(%arg0: i32, %arg1: i32) -> (i32, i32, i32) {
    %c0_i32 = arith.constant 0 : i32
    %c0_i32_0 = arith.constant 0 : i32
    return %arg0, %arg1, %c0_i32 : i32, i32, i32
  }
  func.func @transform_1(%arg0: i32, %arg1: i32) -> (i32, i32) {
    %c0_i32 = arith.constant 0 : i32
    %c0_i32_0 = arith.constant 0 : i32
    %c0_i32_1 = arith.constant 0 : i32
    return %c0_i32, %c0_i32_0 : i32, i32
  }
  func.func @transform_2(%arg0: i32, %arg1: i32) -> (i32, i32) {
    %c0_i32 = arith.constant 0 : i32
    %c0_i32_0 = arith.constant 0 : i32
    %c0_i32_1 = arith.constant 0 : i32
    return %c0_i32, %c0_i32_0 : i32, i32
  }
  func.func @transform_3(%arg0: i32, %arg1: i32) -> (i32, i32, i32) {
    %c0_i32 = arith.constant 0 : i32
    %c0_i32_0 = arith.constant 0 : i32
    %c0_i32_1 = arith.constant 0 : i32
    return %arg0, %c0_i32, %c0_i32_0 : i32, i32, i32
  }
}

</mosaic_0001>

<bundles_post_ra>
// kernel: tpu_custom_call.1
= control target key start
LH: loop header
LB: loop body
LE: loop exit
PB: predicated region body
PF: predicated region fallthrough
CT: control target
= control target key end

     0   :  { %s989_s0 = inlined_call_operand.hbm [shape: f32[2,64,240], index: 0, kind: input, shape index: {}]   ;;  %s990_s1 = inlined_call_operand.hbm [shape: f32[240,128], index: 1, kind: input, shape index: {}]   ;;  %s991_s2 = inlined_call_operand.vmem [shape: f32[1,128], index: 2, kind: input, shape index: {}]   ;;  %s992_s3 = inlined_call_operand.hbm [shape: f32[2,1,128], index: 3, kind: output, shape index: {}]  }
   0x1   :  { %993 = sst [smem:[#allocation12_spill]] %s990_s1 }
   0x2   :  { %8 = vsyncpa [#allocation4], 0 }
   0x3   :  { %10 = vsyncpa [#allocation4 + $0x1], 0 }
   0x4   :  { %11 = vsyncpa [#allocation7], 0 }
   0x5   :  { %12 = vsyncpa [#allocation5], 0 }
   0x6   :  { %14 = vsyncpa [#allocation5 + $0x1], 0  ;;  %s810_s12 = smov 0   ;;  %s812_s13 = smov 0  }
   0x7   :  { %s814_s14 = smov 0   ;;  %s816_s15 = smov 0  }
   0x8   :  { %s818_s16 = smov 0   ;;  %s820_s17 = smov 0  }
   0x9 LB: > { %s506_s18 = sadd.s32 4294967295, %s782_s17   ;;  %s507_s19 = sadd.s32 4294967294, %s782_s17   ;;  %s782_s17 = sphi %s820_s17, %s20_s17   ;;  %s778_s16 = sphi %s818_s16, %s1006_s16   ;;  %s774_s15 = sphi %s816_s15, %s1005_s15   ;;  %s770_s14 = sphi %s814_s14, %s1004_s14   ;;  %s766_s13 = sphi %s812_s13, %s1003_s13   ;;  %s762_s12 = sphi %s810_s12, %s1002_s12  }
   0xa   : > { %p54_p0 = scmp.ne.s32.totalorder %s766_s13, %s762_s12  ;;  %p844_p1 = scmp.eq.s32.totalorder %s506_s18, 0 }
   0xb   : > { %p848_p2 = scmp.eq.s32.totalorder %s506_s18, 1  ;;  %p126_p3 = scmp.eq.s32.totalorder %s507_s19, 1 }
   0xc   : > { %p854_p4 = por %p844_p1, %p54_p0  ;;  %p508_p5 = scmp.ge.s32.totalorder %s782_s17, 1 }
   0xd   : > { %p859_p6 = por %p126_p3, %p54_p0  ;;  %p133_p7 = scmp.lt.s32.totalorder %s782_s17, 3 }
   0xe   : > { %s998_s1 = sld [smem:[#allocation12_spill]]  ;;  %s784_s28 = smov [#allocation6]  }
   0xf   : > { %p867_p8 = pnand %p508_p5, %p133_p7  ;;  %s146_s29 = sshll.u32 %s784_s28, 4  ;;  %s147_s29 = int_to_ptr.vmem [resolvable:$true] %s146_s29 }
  0x10   : > { %p510_p11 = scmp.ge.s32.totalorder %s782_s17, 2  ;;  %s785_s30 = smov 128  }
  0x11   : > { %p566_p9 = pneg %p867_p8  ;;  %s786_s4 = smov 8  }
  0x12   : > { %s32_s5 = sadd.s32 1, %s778_s16  ;;  %s41_s6 = sadd.s32 1, %s770_s14 }
  0x13   : > { %p567_p10 = pnand %p566_p9, %p844_p1  ;;  %p34_p12 = scmp.ge.s32.totalorder %s32_s5, 2 }
  0x14   : > { %s144_s26 = sshll.u32 %s998_s1, 4  ;;  %p48_p13 = scmp.ne.s32.totalorder %s770_s14, %s766_s13  ;;  %s145_s26 = int_to_ptr.hbm [resolvable:$true] %s144_s26 }
  0x15   : > { %569 = dma.hbm_to_vmem [thread:$0]  (!%p567_p10), %s145_s26, 3840, %s147_s29, [#allocation7], %s785_s30, %s785_s30, %s786_s4  }
  0x16   : > { %p49_p0 = scmp.eq.s32.totalorder %s782_s17, 0  ;;  %s1008_s5 = smov (%p34_p12, %s32_s5), 0 }
  0x17   : > { %p889_p5 = por %p848_p2, %p48_p13  ;;  %s36_s9 = ssub.s32 %s778_s16, %s1008_s5 }
  0x18   : > { %p883_p3 = por %p49_p0, %p48_p13  ;;  %p579_p7 = scmp.lt.s32.totalorder %s782_s17, 2 }
  0x19   : > { %p39_p9 = scmp.eq.s32.totalorder %s36_s9, 0  ;;  %s163_s10 = sand.u32 1, %s770_s14  }
  0x1a   : > { %s511_s11 = sshll.u32 %s163_s10, 7  ;;  %s527_s19 = sshll.u32 %s778_s16, 7 }
  0x1b   : > { %s898_s18 = scalar_select %p39_p9, %s770_s14, %s41_s6  }
  0x1c   : > { %s175_s26 = scalar_lea.hbm %s989_s0, %s527_s19  ;;  %s167_s28 = scalar_lea.vmem [#allocation3], %s511_s11 }
  0x1d   : > { %s178_s29 = sshll.u32 %s167_s28, 4  ;;  %s176_s21 = sshll.u32 %s175_s26, 4  ;;  %s179_s29 = int_to_ptr.vmem [resolvable:$true] %s178_s29  ;;  %s177_s21 = int_to_ptr.hbm [resolvable:$true] %s176_s21 }
  0x1e   : > { %p571_p2 = pnand %p579_p7, %p883_p3  ;;  %s164_s30 = scalar_lea.sflag [#allocation4], %s163_s10 }
  0x1f   : > { %s787_s4 = smov 256   ;;  %s788_s1 = smov 16  }
  0x20   : > { %573 = dma.hbm_to_vmem [thread:$0]  (!%p571_p2), %s177_s21, 2048, %s179_s29, %s164_s30, %s787_s4, %s787_s4, %s788_s1  }
  0x21   : > { %190 = sbr.rel (%p867_p8) target bundleno = 269 (0x10d), region = 32  ;;  %s909_s6 = sand.u32 (!%p867_p8), 1, %s766_s13  }
  0x22   : > { %s515_s9 = sshll.u32 (!%p867_p8), %s909_s6, 7  ;;  %s193_s11 = scalar_lea.sflag (!%p867_p8), [#allocation4], %s909_s6 }
  0x23   : > { %s913_s19 = scalar_lea.vmem (!%p867_p8), [#allocation3], %s515_s9 }
  0x26   : > { %749 = dma.done.wait (%p854_p4), %s193_s11, 2048  }
  0x27   : > { %751 = vsyncadd (%p854_p4), %s193_s11, 4294965248 }
  0x28   : > { %753 = dma.done.wait (%p844_p1), [#allocation7], 3840  }
  0x29   : > { %755 = vsyncadd (%p844_p1), [#allocation7], 4294963456  ;;  %v261_v0 = vld [vmem:[#allocation6 + $0x78] sm:$0xff]  ;;  %v275_v1 = vld [vmem:[#allocation6 + $0xe8] sm:$0xff]  ;;  %vm276_vm0 = vcmask 916480   ;;  %v789_v50 = vmov 0.0   ;;  %s415_s22 = scalar_lea.hbm %s992_s3, %s774_s15 }
  0x2a   : > { %v260_v2 = vld [vmem:[#allocation6 + $0x70] sm:$0xff]  ;;  %301 = vmatpush.msra.mxu0 %v261_v0  ;;  %528 = vmatpush.msra.mxu2 %v261_v0  ;;  %v274_v3 = vld [vmem:[#allocation6 + $0xe0] sm:$0xff]  ;;  %v259_v4 = vld [vmem:[#allocation6 + $0x68] sm:$0xff]  ;;  %229 = vst [vmem:[#allocation2] sm:$0x1] %v789_v50  ;;  %s223_s10 = scalar_lea.vmem [#allocation8], %s909_s6 }
  0x2b   : > { %344 = vmatpush.msra.mxu1 %v275_v1  ;;  %544 = vmatpush.msra.mxu3 %v275_v1  ;;  %v273_v5 = vld [vmem:[#allocation6 + $0xd8] sm:$0xff]  ;;  %v258_v6 = vld [vmem:[#allocation6 + $0x60] sm:$0xff]  ;;  %v272_v7 = vld [vmem:[#allocation6 + $0xd0] sm:$0xff]  ;;  %s417_s24 = sshll.u32 %s223_s10, 4  ;;  %s419_s25 = sshll.u32 %s415_s22, 4  ;;  %s418_s24 = int_to_ptr.vmem [resolvable:$true] %s417_s24  ;;  %s420_s25 = int_to_ptr.hbm [resolvable:$true] %s419_s25 }
  0x2c   : > { %302 = vmatpush.msra.mxu0 %v260_v2  ;;  %529 = vmatpush.msra.mxu2 %v260_v2  ;;  %v257_v8 = vld [vmem:[#allocation6 + $0x58] sm:$0xff]  ;;  %v271_v9 = vld [vmem:[#allocation6 + $0xc8] sm:$0xff]  ;;  %v256_v10 = vld [vmem:[#allocation6 + $0x50] sm:$0xff]  ;;  %s407_s26 = scalar_lea.sflag [#allocation5], %s909_s6  ;;  %s710_s28 = sshra.s32 %s420_s25, 4  ;;  %s711_s28 = int_to_ptr.hbm [resolvable:$true] %s710_s28 }
  0x2d   : > { %345 = vmatpush.msra.mxu1 %v274_v3  ;;  %545 = vmatpush.msra.mxu3 %v274_v3  ;;  %v270_v11 = vld [vmem:[#allocation6 + $0xc0] sm:$0xff]  ;;  %v255_v12 = vld [vmem:[#allocation6 + $0x48] sm:$0xff]  ;;  %v269_v13 = vld [vmem:[#allocation6 + $0xb8] sm:$0xff]  ;;  %s712_s29 = scalar_lea.hbm %s711_s28, 1  ;;  %s716_s30 = scalar_lea.hbm %s992_s3, 2 }
  0x2e   : > { %303 = vmatpush.msra.mxu0 %v259_v4  ;;  %530 = vmatpush.msra.mxu2 %v259_v4  ;;  %v254_v14 = vld [vmem:[#allocation6 + $0x40] sm:$0xff]  ;;  %v268_v15 = vld [vmem:[#allocation6 + $0xb0] sm:$0xff]  ;;  %v253_v16 = vld [vmem:[#allocation6 + $0x38] sm:$0xff]  ;;  %p713_p1 = scmp.ne.s32.totalorder %s711_s28, %s712_s29  ;;  %p717_p10 = scmp.lt.s32.totalorder %s711_s28, %s992_s3 }
  0x2f   : > { %346 = vmatpush.msra.mxu1 %v273_v5  ;;  %546 = vmatpush.msra.mxu3 %v273_v5  ;;  %v267_v17 = vld [vmem:[#allocation6 + $0xa8] sm:$0xff]  ;;  %v252_v18 = vld [vmem:[#allocation6 + $0x30] sm:$0xff]  ;;  %v266_v19 = vld [vmem:[#allocation6 + $0xa0] sm:$0xff]  ;;  %p718_p12 = scmp.lt.s32.totalorder %s716_s30, %s712_s29 }
  0x30   : > { %304 = vmatpush.msra.mxu0 %v258_v6  ;;  %531 = vmatpush.msra.mxu2 %v258_v6  ;;  %v251_v20 = vld [vmem:[#allocation6 + $0x28] sm:$0xff]  ;;  %v265_v21 = vld [vmem:[#allocation6 + $0x98] sm:$0xff]  ;;  %v250_v22 = vld [vmem:[#allocation6 + $0x20] sm:$0xff]  ;;  %p714_p4 = pnand %p713_p1, %p889_p5 }
  0x31   : > { %347 = vmatpush.msra.mxu1 %v272_v7  ;;  %547 = vmatpush.msra.mxu3 %v272_v7  ;;  %v264_v23 = vld [vmem:[#allocation6 + $0x90] sm:$0xff]  ;;  %v249_v24 = vld [vmem:[#allocation6 + $0x18] sm:$0xff]  ;;  %v263_v25 = vld [vmem:[#allocation6 + $0x88] sm:$0xff]  ;;  %p719_p13 = por %p718_p12, %p717_p10 }
  0x32   : > { %305 = vmatpush.msra.mxu0 %v257_v8  ;;  %532 = vmatpush.msra.mxu2 %v257_v8  ;;  %v248_v26 = vld [vmem:[#allocation6 + $0x10] sm:$0xff]  ;;  %v262_v27 = vld [vmem:[#allocation6 + $0x80] sm:$0xff]  ;;  %v231_v28 = vld [vmem:[%s913_s19 + $0x8] sm:$0xff]  ;;  %p715_p8 = pneg %p714_p4 }
  0x33   : > { %348 = vmatpush.msra.mxu1 %v271_v9  ;;  %548 = vmatpush.msra.mxu3 %v271_v9  ;;  %v247_v29 = vld [vmem:[#allocation6 + $0x8] sm:$0xff]  ;;  %v241_v30 = vld [vmem:[%s913_s19 + $0x58] sm:$0xff]  ;;  %v246_v31 = vld [vmem:[#allocation6] sm:$0xff] }
  0x34   : > { %306 = vmatpush.msra.mxu0 %v256_v10  ;;  %533 = vmatpush.msra.mxu2 %v256_v10  ;;  %v230_v32 = vld [vmem:[%s913_s19] sm:$0xff]  ;;  %v236_v33 = vld [vmem:[%s913_s19 + $0x30] sm:$0xff]  ;;  %v233_v34 = vld [vmem:[%s913_s19 + $0x18] sm:$0xff]  ;;  %p720_p0 = pnand %p719_p13, %p715_p8 }
  0x35   : > { %349 = vmatpush.msra.mxu1 %v270_v11  ;;  %549 = vmatpush.msra.mxu3 %v270_v11  ;;  %v243_v35 = vld [vmem:[%s913_s19 + $0x68] sm:$0xff]  ;;  %v232_v36 = vld [vmem:[%s913_s19 + $0x10] sm:$0xff]  ;;  %v238_v37 = vld [vmem:[%s913_s19 + $0x40] sm:$0xff] }
  0x36   : > { %307 = vmatpush.msra.mxu0 %v255_v12  ;;  %534 = vmatpush.msra.mxu2 %v255_v12  ;;  %v235_v38 = vld [vmem:[%s913_s19 + $0x28] sm:$0xff]  ;;  %v245_v39 = vld [vmem:[%s913_s19 + $0x78] sm:$0xff]  ;;  %v234_v40 = vld [vmem:[%s913_s19 + $0x20] sm:$0xff] }
  0x37   : > { %350 = vmatpush.msra.mxu1 %v269_v13  ;;  %550 = vmatpush.msra.mxu3 %v269_v13  ;;  %v240_v41 = vld [vmem:[%s913_s19 + $0x50] sm:$0xff]  ;;  %v237_v42 = vld [vmem:[%s913_s19 + $0x38] sm:$0xff]  ;;  %v242_v43 = vld [vmem:[%s913_s19 + $0x60] sm:$0xff] }
  0x38   : > { %308 = vmatpush.msra.mxu0 %v254_v14  ;;  %535 = vmatpush.msra.mxu2 %v254_v14  ;;  %v239_v44 = vld [vmem:[%s913_s19 + $0x48] sm:$0xff]  ;;  %v244_v45 = vld [vmem:[%s913_s19 + $0x70] sm:$0xff] }
  0x39   : > { %351 = vmatpush.msra.mxu1 %v268_v15  ;;  %551 = vmatpush.msra.mxu3 %v268_v15 }
  0x3a   : > { %309 = vmatpush.msra.mxu0 %v253_v16  ;;  %536 = vmatpush.msra.mxu2 %v253_v16 }
  0x3b   : > { %352 = vmatpush.msra.mxu1 %v267_v17  ;;  %552 = vmatpush.msra.mxu3 %v267_v17 }
  0x3c   : > { %310 = vmatpush.msra.mxu0 %v252_v18  ;;  %537 = vmatpush.msra.mxu2 %v252_v18 }
  0x3d   : > { %353 = vmatpush.msra.mxu1 %v266_v19  ;;  %553 = vmatpush.msra.mxu3 %v266_v19  ;;  %v383_v19 = vld [vmem:[#allocation2] sm:$0x1] }
  0x3e   : > { %311 = vmatpush.msra.mxu0 %v251_v20  ;;  %538 = vmatpush.msra.mxu2 %v251_v20 }
  0x3f   : > { %354 = vmatpush.msra.mxu1 %v265_v21  ;;  %554 = vmatpush.msra.mxu3 %v265_v21 }
  0x40   : > { %312 = vmatpush.msra.mxu0 %v250_v22  ;;  %539 = vmatpush.msra.mxu2 %v250_v22  ;;  %v403_v22 = vld [vmem:[%s991_s2] sm:$0x1] }
  0x41   : > { %355 = vmatpush.msra.mxu1 %v264_v23  ;;  %555 = vmatpush.msra.mxu3 %v264_v23 }
  0x42   : > { %313 = vmatpush.msra.mxu0 %v249_v24  ;;  %540 = vmatpush.msra.mxu2 %v249_v24 }
  0x43   : > { %356 = vmatpush.msra.mxu1 %v263_v25  ;;  %556 = vmatpush.msra.mxu3 %v263_v25 }
  0x44   : > { %314 = vmatpush.msra.mxu0 %v248_v26  ;;  %541 = vmatpush.msra.mxu2 %v248_v26 }
  0x45   : > { %357 = vmatpush.msra.mxu1 %v262_v27  ;;  %557 = vmatpush.msra.mxu3 %v262_v27 }
  0x46   : > { %517 = vmatmul.msk.f32.vlgmr.msra.gmra.mxu1 %vm276_vm0, %v231_v28  ;;  %315 = vmatpush.msra.mxu0 %v247_v29 }
  0x47   : > { %542 = vmatpush.msra.mxu2 %v247_v29  ;;  %522 = vmatmul.msk.f32.vlgmr.msra.gmra.mxu3 %vm276_vm0, %v241_v30 }
  0x48   : > { %316 = vmatpush.msra.mxu0 %v246_v31 }
  0x49   : > { %543 = vmatpush.msra.mxu2 %v246_v31  ;;  %317 = vmatmul.f32.vlgmr.msra.gmra.mxu0 %v230_v32 }
  0x4a   : > { %326 = vmatmul.f32.vlgmr.msra.gmra.mxu2 %v236_v33 }
  0x4e   : > { %518 = vmatmul.msk.f32.gmra.mxu1 %vm276_vm0, %v233_v34 }
  0x4f   : > { %523 = vmatmul.msk.f32.gmra.mxu3 %vm276_vm0, %v243_v35 }
  0x51   : > { %320 = vmatmul.f32.gmra.mxu0 %v232_v36 }
  0x52   : > { %329 = vmatmul.f32.gmra.mxu2 %v238_v37 }
  0x56   : > { %519 = vmatmul.msk.f32.gmra.mxu1 %vm276_vm0, %v235_v38 }
  0x57   : > { %524 = vmatmul.msk.f32.gmra.mxu3 %vm276_vm0, %v245_v39 }
  0x59   : > { %323 = vmatmul.f32.gmra.mxu0 %v234_v40 }
  0x5a   : > { %332 = vmatmul.f32.gmra.mxu2 %v240_v41 }
  0x5e   : > { %520 = vmatmul.msk.f32.gmra.mxu1 %vm276_vm0, %v237_v42 }
  0x62   : > { %335 = vmatmul.f32.gmra.mxu2 %v242_v43 }
  0x66   : > { %521 = vmatmul.msk.f32.gmra.mxu1 %vm276_vm0, %v239_v44 }
  0x6a   : > { %338 = vmatmul.f32.gmra.mxu2 %v244_v45 }
  0xc3   : > { %v359_v46 = vpop.f32.mrf.mxu1 }
  0xc6   : > { %v318_v47 = vpop.f32.mrf.mxu0 }
  0xc7   : > { %v360_v59 = vadd.f32 %v359_v46, %v318_v47 }
  0xca   : > { %v374_v54 = vpop.f32.mrf.mxu3 }
  0xcb   : > { %v362_v48 = vpop.f32.mrf.mxu1 }
  0xcd   : > { %v327_v49 = vpop.f32.mrf.mxu2 }
  0xce   : > { %v321_v51 = vpop.f32.mrf.mxu0 }
  0xcf   : > { %v363_v57 = vadd.f32 %v362_v48, %v321_v51 }
  0xd1   : > { %v384_v61 = vadd.f32 %v363_v57, %v360_v59 }
  0xd2   : > { %v377_v63 = vpop.f32.mrf.mxu3 }
  0xd3   : > { %v365_v52 = vpop.f32.mrf.mxu1 }
  0xd5   : > { %v330_v53 = vpop.f32.mrf.mxu2 }
  0xd6   : > { %v324_v55 = vpop.f32.mrf.mxu0 }
  0xd7   : > { %v366_v60 = vadd.f32 %v365_v52, %v324_v55 }
  0xd9   : > { %v385_v0 = vadd.f32 %v384_v61, %v366_v60 }
  0xda   : > { %v380_v8 = vpop.f32.mrf.mxu3 }
  0xdb   : > { %v368_v56 = vpop.f32.mrf.mxu1 }
  0xdc   : > { %v369_v62 = vadd.f32 %v368_v56, %v327_v49 }
  0xdd   : > { %v333_v58 = vpop.f32.mrf.mxu2 }
  0xde   : > { %v386_v2 = vadd.f32 %v385_v0, %v369_v62  ;;  %v375_v6 = vadd.f32 %v374_v54, %v333_v58 }
  0xe3   : > { %v371_v1 = vpop.f32.mrf.mxu1 }
  0xe4   : > { %v372_v3 = vadd.f32 %v371_v1, %v330_v53 }
  0xe5   : > { %v336_v4 = vpop.f32.mrf.mxu2 }
  0xe6   : > { %v387_v5 = vadd.f32 %v386_v2, %v372_v3  ;;  %v378_v9 = vadd.f32 %v377_v63, %v336_v4 }
  0xe8   : > { %v388_v7 = vadd.f32 %v387_v5, %v375_v6 }
  0xea   : > { %v389_v11 = vadd.f32 %v388_v7, %v378_v9 }
  0xed   : > { %v339_v10 = vpop.f32.mrf.mxu2 }
  0xee   : > { %v381_v12 = vadd.f32 %v380_v8, %v339_v10 }
  0xf0   : > { %v390_v13 = vadd.f32 %v389_v11, %v381_v12 }
  0xf2   : > { %v391_v14 = vrot.slane %v390_v13, 4 }
  0xf4   : > { %v392_v15 = vadd.f32 %v391_v14, %v390_v13 }
  0xf6   : > { %v393_v16 = vrot.slane %v392_v15, 2 }
  0xf8   : > { %v394_v17 = vadd.f32 %v393_v16, %v392_v15 }
  0xfa   : > { %v395_v18 = vrot.slane %v394_v17, 1 }
  0xfc   : > { %v396_v20 = vadd.f32 %v395_v18, %v394_v17 }
  0xfe   : > { %v397_v21 = vadd.f32 %v396_v20, %v383_v19 }
 0x100   : > { %398 = vst [vmem:[#allocation2] sm:$0x1] %v397_v21 }
 0x107   : > { %v402_v23 = vld [vmem:[#allocation2] sm:$0x1] }
 0x108   : > { %v404_v24 = vadd.f32 %v403_v22, %v402_v23 }
 0x10a   : > { %405 = vst [vmem:[%s223_s10] sm:$0x1] %v404_v24 }
 0x10b   : > { %723 = shalt.err (!%p720_p0)
}
 0x10c   : > { %564 = dma.vmem_to_hbm [thread:$0]  (%p889_p5), %s418_s24, 16, %s420_s25, %s407_s26  }
 0x10d PF: > { %s431_s6 = sand.u32 1, %s762_s12   ;;  %p575_p3 = pnand %p510_p11, %p859_p6 }
 0x10e   : > { %s432_s11 = scalar_lea.sflag [#allocation5], %s431_s6 }
 0x10f   : > { %p576_p7 = pneg %p575_p3 }
 0x111   : > { %757 = dma.done.wait (%p576_p7), %s432_s11, 16  }
 0x112   : > { %759 = vsyncadd (%p576_p7), %s432_s11, 4294967280  ;;  %s20_s17 = sadd.s32 1, %s782_s17   ;;  %s1002_s12 = smov %s766_s13 }
 0x113   : > { %p17_p9 = scmp.ge.s32.totalorder %s20_s17, 4   ;;  %s1003_s13 = smov %s770_s14 }
 0x114   : > { %s1004_s14 = smov %s898_s18  ;;  %s1005_s15 = smov %s778_s16 }
 0x115   : > { %s1006_s16 = smov %s1008_s5  ;;  %19 = sbr.rel (!%p17_p9) target bundleno = 9 (0x9), region = 89 }
 0x11a   :  { %437 = vsyncpa [#allocation4], 1 }
 0x11b   :  { %439 = vsyncpa [#allocation4 + $0x1], 1 }
 0x11c   :  { %440 = vsyncpa [#allocation7], 1 }
 0x11d   :  { %441 = vsyncpa [#allocation5], 1 }
 0x11e   :  { %443 = vsyncpa [#allocation5 + $0x1], 1 }

</bundles_post_ra>
